<compile_context>
chip_gen: v5e
topology: v5e:2x2
jax: 0.10.0
libtpu: 0.0.40
codegen_flags: <defaults>
</compile_context>

<pallas_src>
import jax
import jax.numpy as jnp
from jax.experimental import pallas as pl
from jax.experimental.pallas import tpu as pltpu


_SUBLANE = 8


def _leaky_relu(x, negative_slope=0.01):
    return jnp.where(x > 0, x, negative_slope * x)


def _round_up(n, m):
    return ((n + m - 1) // m) * m


def ann_cc_kernel(x_ref, w_in_ref, b_in_ref, w_h_ref, b_h_ref,
                  w_out_ref, b_out_ref, o_ref):
    # x_ref: [TB, in]   weights: [fan_in, fan_out]   biases: [1, fan_out]
    # Layer 0: input_layer + leaky_relu (f32 accumulation on the MXU).
    h = jnp.dot(x_ref[...], w_in_ref[...], preferred_element_type=jnp.float32)
    h = _leaky_relu(h + b_in_ref[...])

    # Layers 1-3: the SAME hidden_layer weights applied three times.
    w_h = w_h_ref[...]
    # Hoist the bias broadcast out of the unrolled loop (no CSE of broadcast_in_dim).
    b_h = jnp.broadcast_to(b_h_ref[...], h.shape)
    for _ in range(3):
        h = jnp.dot(h.astype(w_h.dtype), w_h, preferred_element_type=jnp.float32)
        h = _leaky_relu(h + b_h)

    # output_layer (no activation).
    y = jnp.dot(h.astype(w_h.dtype), w_out_ref[...],
                preferred_element_type=jnp.float32)
    o_ref[...] = (y + b_out_ref[...]).astype(o_ref.dtype)


def prepare_params(w_in, b_in, w_h, b_h, w_out, b_out, param_dtype=jnp.float32):
    """One-time parameter preparation (kept out of the per-call forward).

    Weights are [fan_in, fan_out] (transpose of torch.nn.Linear.weight) cast to
    `param_dtype` (pass jnp.bfloat16 on v6e/v7x for the bf16-native MXU); biases
    stay f32 with shape [1, fan_out]."""
    cast_w = lambda w: jnp.asarray(w, param_dtype)
    cast_b = lambda b: jnp.asarray(b, jnp.float32).reshape(1, -1)
    return (cast_w(w_in), cast_b(b_in),
            cast_w(w_h), cast_b(b_h),
            cast_w(w_out), cast_b(b_out))


def ann_cc_forward(x, params, *, block_b=1024):
    """x: [B, in_neuron]; params from prepare_params()."""
    w_in, b_in, w_h, b_h, w_out, b_out = params
    B, in_neuron = x.shape
    out_neuron = w_out.shape[1]
    out_dtype = x.dtype

    # Feed x to the MXU in the weights' dtype (halves x DMA bytes on the bf16 path);
    # no-op for the default f32 path.
    if x.dtype != w_in.dtype:
        x = x.astype(w_in.dtype)

    # Batch tile: sublane-aligned, capped at block_b.  Ragged batches get a partial
    # last block (rows never mix, and out-of-range output rows are dropped on store).
    tb = min(block_b, _round_up(B, _SUBLANE))
    if B > _SUBLANE and pl.cdiv(B, tb) < 2:
        # Give the "parallel" batch axis >= 2 steps so v7x's second TC gets work.
        tb = _round_up(pl.cdiv(B, 2), _SUBLANE)
    tb = max(_SUBLANE, _round_up(tb, _SUBLANE))
    grid = (pl.cdiv(B, tb),)

    def full(a):
        # Full-extent, constant-index block: DMA'd once, VMEM-resident across steps.
        return pl.BlockSpec(a.shape, lambda i: (0,) * a.ndim)

    return pl.pallas_call(
        ann_cc_kernel,
        out_shape=jax.ShapeDtypeStruct((B, out_neuron), out_dtype),
        grid=grid,
        in_specs=[
            pl.BlockSpec((tb, in_neuron), lambda i: (i, 0)),   # batch-tiled activations
            full(w_in), full(b_in),
            full(w_h), full(b_h),
            full(w_out), full(b_out),
        ],
        out_specs=pl.BlockSpec((tb, out_neuron), lambda i: (i, 0)),
        compiler_params=pltpu.CompilerParams(
            dimension_semantics=("parallel",)),                # megacore-shard batch (v7x)
    )(x, w_in, b_in, w_h, b_h, w_out, b_out)


def init_linear(key, fan_in, fan_out):
    """Matches torch.nn.Linear's U(-1/sqrt(fan_in), +1/sqrt(fan_in)) init.
    Weight returned pre-transposed to [fan_in, fan_out]; bias as [1, fan_out]."""
    kw, kb = jax.random.split(key)
    bound = 1.0 / jnp.sqrt(fan_in)
    w = jax.random.uniform(kw, (fan_in, fan_out), jnp.float32, -bound, bound)
    b = jax.random.uniform(kb, (1, fan_out), jnp.float32, -bound, bound)
    return w, b


def reference_forward(x, w_in, b_in, w_h, b_h, w_out, b_out):
    h = _leaky_relu(x @ w_in + b_in)
    for _ in range(3):
        h = _leaky_relu(h @ w_h + b_h)
    return h @ w_out + b_out


if __name__ == "__main__":
    in_neuron, hidden_neuron, out_neuron = 16, 32, 4

    key = jax.random.PRNGKey(0)
    k_x, k_x2, k_in, k_h, k_out = jax.random.split(key, 5)

    w_in, b_in = init_linear(k_in, in_neuron, hidden_neuron)
    w_h, b_h = init_linear(k_h, hidden_neuron, hidden_neuron)
    w_out, b_out = init_linear(k_out, hidden_neuron, out_neuron)

    params_f32 = prepare_params(w_in, b_in, w_h, b_h, w_out, b_out)

    # Small single-tile case (grid = (1,)).
    batch = 8
    x = jax.random.normal(k_x, (batch, in_neuron), jnp.float32)
    y = jax.block_until_ready(ann_cc_forward(x, params_f32))
    y_ref = reference_forward(x, w_in, b_in, w_h, b_h, w_out, b_out)
    assert y.shape == (batch, out_neuron)
    assert jnp.allclose(y, y_ref, atol=1e-5, rtol=1e-5)

    # Ragged batch exercising the batch grid with a partial last tile (no padding of B).
    batch2 = 300
    x2 = jax.random.normal(k_x2, (batch2, in_neuron), jnp.float32)
    y2 = jax.block_until_ready(ann_cc_forward(x2, params_f32))
    y2_ref = reference_forward(x2, w_in, b_in, w_h, b_h, w_out, b_out)
    assert y2.shape == (batch2, out_neuron)
    assert jnp.allclose(y2, y2_ref, atol=1e-5, rtol=1e-5)

    # bf16-parameter perf path (bf16-native MXU on v6e/v7x); accumulation stays f32,
    # so only a loose tolerance vs. the f32 reference is expected.
    params_bf16 = prepare_params(w_in, b_in, w_h, b_h, w_out, b_out,
                                 param_dtype=jnp.bfloat16)
    y3 = jax.block_until_ready(ann_cc_forward(x2, params_bf16))
    assert y3.shape == (batch2, out_neuron)
    assert jnp.allclose(y3.astype(jnp.float32), y2_ref, atol=1e-1, rtol=1e-1)

    print("KERNEL_OK")
</pallas_src>

<mosaic_0001>
module attributes {stable_mosaic.version = 11 : i64} {
  func.func @ann_cc_kernel(%arg0: i32, %arg1: memref<8x16xf32, #tpu.memory_space<vmem>>, %arg2: memref<16x32xf32, #tpu.memory_space<vmem>>, %arg3: memref<1x32xf32, #tpu.memory_space<vmem>>, %arg4: memref<32x32xf32, #tpu.memory_space<vmem>>, %arg5: memref<1x32xf32, #tpu.memory_space<vmem>>, %arg6: memref<32x4xf32, #tpu.memory_space<vmem>>, %arg7: memref<1x4xf32, #tpu.memory_space<vmem>>, %arg8: memref<8x4xf32, #tpu.memory_space<vmem>>) attributes {dimension_semantics = [#tpu.dimension_semantics<parallel>], iteration_bounds = array<i64: 1>, scalar_prefetch = 0 : i64, scratch_operands = 0 : i64, tpu.core_type = #tpu.core_type<tc>, window_params = [{transform_indices = @transform_0, window_bounds = array<i64: 8, 16>}, {pipeline_mode = #tpu.pipeline_mode<synchronous>, transform_indices = @transform_1, window_bounds = array<i64: 16, 32>}, {pipeline_mode = #tpu.pipeline_mode<synchronous>, transform_indices = @transform_2, window_bounds = array<i64: 1, 32>}, {pipeline_mode = #tpu.pipeline_mode<synchronous>, transform_indices = @transform_3, window_bounds = array<i64: 32, 32>}, {pipeline_mode = #tpu.pipeline_mode<synchronous>, transform_indices = @transform_4, window_bounds = array<i64: 1, 32>}, {pipeline_mode = #tpu.pipeline_mode<synchronous>, transform_indices = @transform_5, window_bounds = array<i64: 32, 4>}, {pipeline_mode = #tpu.pipeline_mode<synchronous>, transform_indices = @transform_6, window_bounds = array<i64: 1, 4>}, {transform_indices = @transform_7, window_bounds = array<i64: 8, 4>}]} {
    %c0 = arith.constant 0 : index
    %c0_0 = arith.constant 0 : index
    %0 = vector.load %arg1[%c0, %c0_0] : memref<8x16xf32, #tpu.memory_space<vmem>>, vector<8x16xf32>
    %c0_1 = arith.constant 0 : index
    %c0_2 = arith.constant 0 : index
    %1 = vector.load %arg2[%c0_1, %c0_2] : memref<16x32xf32, #tpu.memory_space<vmem>>, vector<16x32xf32>
    %cst = arith.constant dense<0.000000e+00> : vector<8x32xf32>
    %2 = tpu.matmul %0, %1, %cst {dimension_numbers = #tpu.dot_dimension_numbers<[1], [0], [0], [1], [0, 0, 1, 1], [], []>} : vector<8x16xf32>, vector<16x32xf32>, vector<8x32xf32> -> vector<8x32xf32>
    %c0_3 = arith.constant 0 : index
    %c0_4 = arith.constant 0 : index
    %3 = vector.load %arg3[%c0_3, %c0_4] : memref<1x32xf32, #tpu.memory_space<vmem>>, vector<1x32xf32>
    %4 = vector.broadcast %3 : vector<1x32xf32> to vector<8x32xf32>
    %5 = arith.addf %2, %4 : vector<8x32xf32>
    %cst_5 = arith.constant 0.000000e+00 : f32
    %6 = vector.broadcast %cst_5 : f32 to vector<8x32xf32>
    %7 = arith.cmpf ogt, %5, %6 : vector<8x32xf32>
    %cst_6 = arith.constant 0.00999999977 : f32
    %8 = vector.broadcast %cst_6 : f32 to vector<8x32xf32>
    %9 = arith.mulf %8, %5 : vector<8x32xf32>
    %10 = arith.select %7, %5, %9 : vector<8x32xi1>, vector<8x32xf32>
    %c0_7 = arith.constant 0 : index
    %c0_8 = arith.constant 0 : index
    %11 = vector.load %arg4[%c0_7, %c0_8] : memref<32x32xf32, #tpu.memory_space<vmem>>, vector<32x32xf32>
    %c0_9 = arith.constant 0 : index
    %c0_10 = arith.constant 0 : index
    %12 = vector.load %arg5[%c0_9, %c0_10] : memref<1x32xf32, #tpu.memory_space<vmem>>, vector<1x32xf32>
    %13 = vector.shape_cast %12 : vector<1x32xf32> to vector<1x32xf32>
    %14 = vector.broadcast %13 : vector<1x32xf32> to vector<8x32xf32>
    %cst_11 = arith.constant dense<0.000000e+00> : vector<8x32xf32>
    %15 = tpu.matmul %10, %11, %cst_11 {dimension_numbers = #tpu.dot_dimension_numbers<[1], [0], [0], [1], [0, 0, 1, 1], [], []>} : vector<8x32xf32>, vector<32x32xf32>, vector<8x32xf32> -> vector<8x32xf32>
    %16 = arith.addf %15, %14 : vector<8x32xf32>
    %cst_12 = arith.constant 0.000000e+00 : f32
    %17 = vector.broadcast %cst_12 : f32 to vector<8x32xf32>
    %18 = arith.cmpf ogt, %16, %17 : vector<8x32xf32>
    %cst_13 = arith.constant 0.00999999977 : f32
    %19 = vector.broadcast %cst_13 : f32 to vector<8x32xf32>
    %20 = arith.mulf %19, %16 : vector<8x32xf32>
    %21 = arith.select %18, %16, %20 : vector<8x32xi1>, vector<8x32xf32>
    %cst_14 = arith.constant dense<0.000000e+00> : vector<8x32xf32>
    %22 = tpu.matmul %21, %11, %cst_14 {dimension_numbers = #tpu.dot_dimension_numbers<[1], [0], [0], [1], [0, 0, 1, 1], [], []>} : vector<8x32xf32>, vector<32x32xf32>, vector<8x32xf32> -> vector<8x32xf32>
    %23 = arith.addf %22, %14 : vector<8x32xf32>
    %cst_15 = arith.constant 0.000000e+00 : f32
    %24 = vector.broadcast %cst_15 : f32 to vector<8x32xf32>
    %25 = arith.cmpf ogt, %23, %24 : vector<8x32xf32>
    %cst_16 = arith.constant 0.00999999977 : f32
    %26 = vector.broadcast %cst_16 : f32 to vector<8x32xf32>
    %27 = arith.mulf %26, %23 : vector<8x32xf32>
    %28 = arith.select %25, %23, %27 : vector<8x32xi1>, vector<8x32xf32>
    %cst_17 = arith.constant dense<0.000000e+00> : vector<8x32xf32>
    %29 = tpu.matmul %28, %11, %cst_17 {dimension_numbers = #tpu.dot_dimension_numbers<[1], [0], [0], [1], [0, 0, 1, 1], [], []>} : vector<8x32xf32>, vector<32x32xf32>, vector<8x32xf32> -> vector<8x32xf32>
    %30 = arith.addf %29, %14 : vector<8x32xf32>
    %cst_18 = arith.constant 0.000000e+00 : f32
    %31 = vector.broadcast %cst_18 : f32 to vector<8x32xf32>
    %32 = arith.cmpf ogt, %30, %31 : vector<8x32xf32>
    %cst_19 = arith.constant 0.00999999977 : f32
    %33 = vector.broadcast %cst_19 : f32 to vector<8x32xf32>
    %34 = arith.mulf %33, %30 : vector<8x32xf32>
    %35 = arith.select %32, %30, %34 : vector<8x32xi1>, vector<8x32xf32>
    %c0_20 = arith.constant 0 : index
    %c0_21 = arith.constant 0 : index
    %36 = vector.load %arg6[%c0_20, %c0_21] : memref<32x4xf32, #tpu.memory_space<vmem>>, vector<32x4xf32>
    %cst_22 = arith.constant dense<0.000000e+00> : vector<8x4xf32>
    %37 = tpu.matmul %35, %36, %cst_22 {dimension_numbers = #tpu.dot_dimension_numbers<[1], [0], [0], [1], [0, 0, 1, 1], [], []>} : vector<8x32xf32>, vector<32x4xf32>, vector<8x4xf32> -> vector<8x4xf32>
    %c0_23 = arith.constant 0 : index
    %c0_24 = arith.constant 0 : index
    %38 = vector.load %arg7[%c0_23, %c0_24] : memref<1x4xf32, #tpu.memory_space<vmem>>, vector<1x4xf32>
    %39 = vector.broadcast %38 : vector<1x4xf32> to vector<8x4xf32>
    %40 = arith.addf %37, %39 : vector<8x4xf32>
    %c0_25 = arith.constant 0 : index
    %c0_26 = arith.constant 0 : index
    %41 = vector.load %arg8[%c0_25, %c0_26] : memref<8x4xf32, #tpu.memory_space<vmem>>, vector<8x4xf32>
    tpu.vector_store %arg8[%c0_25, %c0_26], %40 {strides = array<i32>} : memref<8x4xf32, #tpu.memory_space<vmem>>, vector<8x4xf32>,
    return
  }
  func.func @transform_0(%arg0: i32) -> (i32, i32) {
    %c0_i32 = arith.constant 0 : i32
    %c0_i32_0 = arith.constant 0 : i32
    return %arg0, %c0_i32 : i32, i32
  }
  func.func @transform_1(%arg0: i32) -> (i32, i32) {
    %c0_i32 = arith.constant 0 : i32
    %c0_i32_0 = arith.constant 0 : i32
    %c0_i32_1 = arith.constant 0 : i32
    return %c0_i32, %c0_i32_0 : i32, i32
  }
  func.func @transform_2(%arg0: i32) -> (i32, i32) {
    %c0_i32 = arith.constant 0 : i32
    %c0_i32_0 = arith.constant 0 : i32
    %c0_i32_1 = arith.constant 0 : i32
    return %c0_i32, %c0_i32_0 : i32, i32
  }
  func.func @transform_3(%arg0: i32) -> (i32, i32) {
    %c0_i32 = arith.constant 0 : i32
    %c0_i32_0 = arith.constant 0 : i32
    %c0_i32_1 = arith.constant 0 : i32
    return %c0_i32, %c0_i32_0 : i32, i32
  }
  func.func @transform_4(%arg0: i32) -> (i32, i32) {
    %c0_i32 = arith.constant 0 : i32
    %c0_i32_0 = arith.constant 0 : i32
    %c0_i32_1 = arith.constant 0 : i32
    return %c0_i32, %c0_i32_0 : i32, i32
  }
  func.func @transform_5(%arg0: i32) -> (i32, i32) {
    %c0_i32 = arith.constant 0 : i32
    %c0_i32_0 = arith.constant 0 : i32
    %c0_i32_1 = arith.constant 0 : i32
    return %c0_i32, %c0_i32_0 : i32, i32
  }
  func.func @transform_6(%arg0: i32) -> (i32, i32) {
    %c0_i32 = arith.constant 0 : i32
    %c0_i32_0 = arith.constant 0 : i32
    %c0_i32_1 = arith.constant 0 : i32
    return %c0_i32, %c0_i32_0 : i32, i32
  }
  func.func @transform_7(%arg0: i32) -> (i32, i32) {
    %c0_i32 = arith.constant 0 : i32
    %c0_i32_0 = arith.constant 0 : i32
    return %arg0, %c0_i32 : i32, i32
  }
}

</mosaic_0001>

<bundles_post_ra>
// kernel: tpu_custom_call.1
= control target key start
LH: loop header
LB: loop body
LE: loop exit
PB: predicated region body
PF: predicated region fallthrough
CT: control target
= control target key end

     0   :  { %12 = vsyncpa [#allocation3], 0  ;;  %s370_s0 = inlined_call_operand.hbm [shape: f32[8,16], index: 0, kind: input, shape index: {}]   ;;  %s371_s1 = inlined_call_operand.hbm [shape: f32[16,32], index: 1, kind: input, shape index: {}]   ;;  %s372_s2 = inlined_call_operand.vmem [shape: f32[1,32], index: 2, kind: input, shape index: {}]   ;;  %s373_s3 = inlined_call_operand.vmem [shape: f32[32,32], index: 3, kind: input, shape index: {}]   ;;  %s374_s4 = inlined_call_operand.vmem [shape: f32[1,32], index: 4, kind: input, shape index: {}]   ;;  %s375_s5 = inlined_call_operand.vmem [shape: f32[32,4], index: 5, kind: input, shape index: {}]   ;;  %s376_s6 = inlined_call_operand.vmem [shape: f32[1,4], index: 6, kind: input, shape index: {}]   ;;  %s377_s7 = inlined_call_operand.vmem [shape: f32[8,4], index: 7, kind: output, shape index: {}]  }
   0x1   :  { %s19_s26 = sshll.u32 %s370_s0, 4  ;;  %s20_s26 = int_to_ptr.hbm [resolvable:$true] %s19_s26 }
   0x2   :  { %13 = vsyncpa [#allocation5], 0  ;;  %s280_s27 = smov [#allocation2]   ;;  %s29_s8 = sshll.u32 %s371_s1, 4  ;;  %s30_s8 = int_to_ptr.hbm [resolvable:$true] %s29_s8 }
   0x3   :  { %s21_s28 = sshll.u32 %s280_s27, 4  ;;  %s281_s9 = smov [#allocation4]   ;;  %s22_s28 = int_to_ptr.vmem [resolvable:$true] %s21_s28 }
   0x4   :  { %24 = dma.hbm_to_vmem [thread:$0]  %s20_s26, 128, %s22_s28, [#allocation3]  }
   0x5   :  { %s31_s10 = sshll.u32 %s281_s9, 4  ;;  %s282_s11 = smov 128   ;;  %s32_s10 = int_to_ptr.vmem [resolvable:$true] %s31_s10 }
   0x6   :  { %s283_s12 = smov 8  }
   0x7   :  { %37 = dma.hbm_to_vmem [thread:$0]  %s30_s8, 256, %s32_s10, [#allocation5], %s282_s11, %s282_s11, %s283_s12  }
   0x8   :  { %276 = dma.done.wait [#allocation3], 128  }
   0x9   :  { %277 = vsyncadd [#allocation3], 4294967168 }
   0xa   :  { %278 = dma.done.wait [#allocation5], 256  }
   0xb   :  { %279 = vsyncadd [#allocation5], 4294967040  ;;  %v58_v0 = vld [vmem:[#allocation4 + $0x8] sm:$0xff]  ;;  %v57_v1 = vld [vmem:[#allocation4] sm:$0xff]  ;;  %vm63_vm0 = vcmask 130048   ;;  %vm98_vm2 = vcmask 261120  }
   0xc   :  { %81 = vmatpush.msra.mxu0 %v58_v0  ;;  %v56_v2 = vld [vmem:[#allocation2] sm:$0xff]  ;;  %v93_v3 = vld [vmem:[%s373_s3 + $0x18] sm:$0xff]  ;;  %v92_v4 = vld [vmem:[%s373_s3 + $0x10] sm:$0xff]  ;;  %vm208_vm6 = vcmask 31744  }
   0xd   :  { %114 = vmatpush.msra.mxu1 %v93_v3  ;;  %140 = vmatpush.msra.mxu2 %v93_v3  ;;  %v91_v5 = vld [vmem:[%s373_s3 + $0x8] sm:$0xff]  ;;  %v90_v6 = vld [vmem:[%s373_s3] sm:$0xff]  ;;  %v180_v17 = vld [vmem:[%s375_s5 + $0x18] sm:$0xff] }
   0xe   :  { %82 = vmatpush.msra.mxu0 %v57_v1  ;;  %166 = vmatpush.msra.mxu3 %v93_v3  ;;  %v225_v7 = vld [vmem:[%s372_s2] ss:$0 sm:$0xff]  ;;  %v179_v22 = vld [vmem:[%s375_s5 + $0x10] sm:$0xff]  ;;  %v178_v23 = vld [vmem:[%s375_s5 + $0x8] sm:$0xff] }
   0xf   :  { %216 = vmatmul.msk.f32.vlgmr.msra.gmra.mxu0 %vm63_vm0, %v56_v2  ;;  %115 = vmatpush.msra.mxu1 %v92_v4  ;;  %v226_v12 = vld [vmem:[%s374_s4] ss:$0 sm:$0xff] }
  0x10   :  { %141 = vmatpush.msra.mxu2 %v92_v4  ;;  %167 = vmatpush.msra.mxu3 %v92_v4  ;;  %v177_v24 = vld [vmem:[%s375_s5] sm:$0xff] }
  0x11   :  { %116 = vmatpush.msra.mxu1 %v91_v5  ;;  %200 = vmatpush.msrb.mxu0 %v180_v17  ;;  %v227_v29 = vld [vmem:[%s376_s6] ss:$0 sm:$0xff] }
  0x12   :  { %142 = vmatpush.msra.mxu2 %v91_v5  ;;  %168 = vmatpush.msra.mxu3 %v91_v5 }
  0x13   :  { %117 = vmatpush.msra.mxu1 %v90_v6  ;;  %201 = vmatpush.msrb.mxu0 %v179_v22 }
  0x14   :  { %143 = vmatpush.msra.mxu2 %v90_v6  ;;  %169 = vmatpush.msra.mxu3 %v90_v6 }
  0x15   :  { %202 = vmatpush.msrb.mxu0 %v178_v23 }
  0x17   :  { %203 = vmatpush.msrb.mxu0 %v177_v24 }
  0x8c   :  { %v84_v8 = vpop.f32.mrf.mxu0 }
  0x8d   :  { %v85_v9 = vadd.f32 %v225_v7, %v84_v8 }
  0x8f   :  { %v88_v10 = vmul.f32 0.01, %v85_v9  ;;  %vm87_vm1 = vcmp.gt.f32.partialorder %v85_v9, 0.0 }
  0x91   :  { %v89_v11 = vsel %vm87_vm1, %v85_v9, %v88_v10 }
  0x92   :  { %217 = vmatmul.msk.f32.vlgmr.msra.gmra.mxu1 %vm98_vm2, %v89_v11 }
 0x10f   :  { %v119_v13 = vpop.f32.mrf.mxu1 }
 0x110   :  { %v120_v14 = vadd.f32 %v226_v12, %v119_v13 }
 0x112   :  { %v123_v15 = vmul.f32 0.01, %v120_v14  ;;  %vm122_vm3 = vcmp.gt.f32.partialorder %v120_v14, 0.0 }
 0x114   :  { %v124_v16 = vsel %vm122_vm3, %v120_v14, %v123_v15 }
 0x115   :  { %218 = vmatmul.msk.f32.vlgmr.msra.gmra.mxu2 %vm98_vm2, %v124_v16 }
 0x198   :  { %v145_v18 = vpop.f32.mrf.mxu2 }
 0x199   :  { %v146_v19 = vadd.f32 %v226_v12, %v145_v18 }
 0x19b   :  { %v149_v20 = vmul.f32 0.01, %v146_v19  ;;  %vm148_vm4 = vcmp.gt.f32.partialorder %v146_v19, 0.0 }
 0x19d   :  { %v150_v21 = vsel %vm148_vm4, %v146_v19, %v149_v20 }
 0x19e   :  { %219 = vmatmul.msk.f32.vlgmr.msra.gmra.mxu3 %vm98_vm2, %v150_v21 }
 0x221   :  { %v171_v25 = vpop.f32.mrf.mxu3 }
 0x222   :  { %v172_v26 = vadd.f32 %v226_v12, %v171_v25 }
 0x224   :  { %vm174_vm5 = vcmp.gt.f32.partialorder %v172_v26, 0.0  ;;  %v175_v27 = vmul.f32 0.01, %v172_v26 }
 0x226   :  { %v176_v28 = vsel %vm174_vm5, %v172_v26, %v175_v27 }
 0x227   :  { %220 = vmatmul.msk.f32.vlgmr.msrb.gmra.mxu0 %vm98_vm2, %v176_v28 }
 0x2a4   :  { %v205_v30 = vpop.f32.mrf.mxu0 }
 0x2a5   :  { %v206_v31 = vadd.f32 %v227_v29, %v205_v30 }
 0x2a7   :  { %209 = vst.msk [vmem:[%s377_s7] sm:$0xff] %vm208_vm6, %v206_v31 }
 0x2a8   :  { %214 = vsyncpa [#allocation3], 1 }
 0x2a9   :  { %215 = vsyncpa [#allocation5], 1 }

</bundles_post_ra>
